<compile_context>
chip_gen: v6e
topology: v6e:2x2x1
jax: 0.10.0
libtpu: 0.0.40
codegen_flags: <defaults>
</compile_context>

<pallas_src>
import functools

import jax
import jax.numpy as jnp
from jax.experimental import pallas as pl
from jax.experimental.pallas import tpu as pltpu

LN_EPS = 1e-5  # torch.nn.LayerNorm default


def _cdiv(a, b):
    return (a + b - 1) // b


def _round_up(x, m):
    return ((x + m - 1) // m) * m


def _pooler_end_logits_kernel(hs_ref, sp_ref, w0h_ref, w0s_ref, b0_ref,
                              w1_ref, b1_ref, out_ref):
    # hs_ref: (TM, Dh)   sp_ref: (TM, Ds)
    # w0h_ref: (Dh, H)   w0s_ref: (Ds, H)   b0_ref: (1, H)
    # w1_ref: (H, C)  [gamma folded in]     b1_ref: (1, C)  [beta folded in]
    # out_ref: (TM, C)

    # dense_0 main contraction (K = Dh) on the MXU, f32 accumulation.
    h = jnp.dot(hs_ref[...], w0h_ref[...], preferred_element_type=jnp.float32)

    # Tiny-K half of the concat contraction on the VPU: Ds broadcast
    # multiply-adds into the f32 accumulator (no MXU N-pushes, no XLU).
    sp = sp_ref[...].astype(jnp.float32)
    w0s = w0s_ref[...].astype(jnp.float32)
    for k in range(sp_ref.shape[-1]):  # Ds is static and tiny (num_classes)
        h = h + sp[:, k:k + 1] * w0s[k:k + 1, :]

    # Bias + tanh (EUP).
    # TODO(synk): if profiling shows the EUP is the binding unit on v6e/v7x,
    # run the tanh in bf16 and cast back to f32 for the LN stats (no such
    # lever on v5e: its EUP is f32-only).
    h = jnp.tanh(h + b0_ref[...].astype(jnp.float32))

    # LayerNorm statistics in a single pass (biased variance, eps inside
    # rsqrt — matches torch.nn.LayerNorm).  gamma/beta are folded into W1/b1.
    inv_h = 1.0 / h.shape[-1]
    s1 = jnp.sum(h, axis=-1, keepdims=True)
    s2 = jnp.sum(h * h, axis=-1, keepdims=True)
    mean = s1 * inv_h
    var = jnp.maximum(s2 * inv_h - mean * mean, 0.0)
    h = (h - mean) * jax.lax.rsqrt(var + LN_EPS)

    # dense_1 (with the LN affine pre-folded).  C is tiny, so the (TM, C)
    # store is lane-masked; absolute bytes are small so we don't lane-pad
    # unless profiling shows a store tail.
    out = jnp.dot(h.astype(w1_ref.dtype), w1_ref[...],
                  preferred_element_type=jnp.float32)
    out_ref[...] = (out + b1_ref[...].astype(jnp.float32)).astype(out_ref.dtype)


def _vmem_bytes_estimate(tm_rows, dh, ds, h, c, act_itemsize, w_itemsize,
                         single_buffer_weights):
    acts = 2 * tm_rows * (dh + ds) * act_itemsize          # double-buffered inputs
    outs = 2 * tm_rows * c * act_itemsize                   # double-buffered output
    wmul = 1 if single_buffer_weights else 2
    wbuf = wmul * (dh * h + ds * h + h + h * c + c) * w_itemsize
    inter = 3 * tm_rows * h * 4                              # f32 intermediates
    return acts + outs + wbuf + inter


@functools.partial(jax.jit, static_argnames=("tm", "single_buffer_weights"))
def pooler_end_logits(hidden_states, start_position, params, *, tm=1024,
                      single_buffer_weights=True):
    """hidden_states: [B, S, Dh], start_position: [B, S, Ds]; returns [B, S, C].

    Weights are stored (in_features, out_features), i.e. the kernel computes
    x @ W (equivalent to PyTorch's x @ weight.T).
    """
    w0, b0, gamma, beta, w1, b1 = (
        params["w0"], params["b0"], params["gamma"], params["beta"],
        params["w1"], params["b1"],
    )
    B, S, Dh = hidden_states.shape
    Ds = start_position.shape[-1]
    H = w0.shape[1]
    C = w1.shape[1]
    assert w0.shape[0] == Dh + Ds, "W0 rows must equal Dh + Ds (concat width)"

    M = B * S
    # Balanced row tile: roughly equal tiles, multiple of 16 (covers bf16
    # sublane packing too), padding bounded to < 16 zero rows per tile.
    TM = max(16, _round_up(_cdiv(M, _cdiv(M, tm)), 16))
    M_pad = _round_up(M, TM)
    grid_m = M_pad // TM

    hs2d = hidden_states.reshape(M, Dh)
    sp2d = start_position.reshape(M, Ds)
    if M_pad != M:
        hs2d = jnp.pad(hs2d, ((0, M_pad - M), (0, 0)))
        sp2d = jnp.pad(sp2d, ((0, M_pad - M), (0, 0)))

    # Pre-split W0 so the concat never materializes in HBM.
    w0_hs = w0[:Dh, :]
    w0_sp = w0[Dh:, :]
    b0_2d = b0.reshape(1, H)

    # Fold the LayerNorm affine into dense_1 (exact: affine followed by linear).
    w1_f32 = w1.astype(jnp.float32)
    w1_fold = (gamma.astype(jnp.float32)[:, None] * w1_f32).astype(w1.dtype)
    b1_fold = (b1.astype(jnp.float32)
               + beta.astype(jnp.float32) @ w1_f32).reshape(1, C)

    def _resident_spec(shape):
        idx = lambda i: (0, 0)
        if single_buffer_weights:
            # Constant index_map => double-buffering buys nothing; keep one copy.
            return pl.BlockSpec(shape, idx, pipeline_mode=pl.Buffered(1))
        return pl.BlockSpec(shape, idx)

    est = _vmem_bytes_estimate(
        TM, Dh, Ds, H, C,
        jnp.dtype(hidden_states.dtype).itemsize,
        jnp.dtype(w0.dtype).itemsize,
        single_buffer_weights)
    vmem_limit = int(min(48 * 2**20, 1.5 * est))
    compiler_params = pltpu.CompilerParams(
        dimension_semantics=("parallel",),
        # Only override when we actually need more than the smallest scoped
        # default (16 MiB on v5e); cap leaves headroom under v7x's 64 MiB.
        vmem_limit_bytes=vmem_limit if vmem_limit > 16 * 2**20 else None,
    )

    # TODO(synk): for real BERT shapes (H = 772, not a multiple of 128),
    # lane-padding H needs the LN stats divided by the true H only — trivial
    # with the one-pass s1/s2 form above, but not wired up here.
    out = pl.pallas_call(
        _pooler_end_logits_kernel,
        out_shape=jax.ShapeDtypeStruct((M_pad, C), hidden_states.dtype),
        grid=(grid_m,),
        in_specs=[
            pl.BlockSpec((TM, Dh), lambda i: (i, 0)),   # hidden_states tile
            pl.BlockSpec((TM, Ds), lambda i: (i, 0)),   # start_position tile
            _resident_spec((Dh, H)),                    # W0[:Dh]   (resident)
            _resident_spec((Ds, H)),                    # W0[Dh:]   (resident)
            _resident_spec((1, H)),                     # b0        (resident)
            _resident_spec((H, C)),                     # W1'       (resident)
            _resident_spec((1, C)),                     # b1'       (resident)
        ],
        out_specs=pl.BlockSpec((TM, C), lambda i: (i, 0)),
        compiler_params=compiler_params,
    )(hs2d, sp2d, w0_hs, w0_sp, b0_2d, w1_fold, b1_fold)

    return out[:M].reshape(B, S, C)


def _reference(hidden_states, start_position, params):
    """Unfused reference matching the PyTorch module exactly."""
    x = jnp.concatenate([hidden_states, start_position], axis=-1).astype(jnp.float32)
    h = x @ params["w0"].astype(jnp.float32) + params["b0"]
    h = jnp.tanh(h)
    mean = jnp.mean(h, axis=-1, keepdims=True)
    var = jnp.mean(jnp.square(h - mean), axis=-1, keepdims=True)
    h = (h - mean) / jnp.sqrt(var + LN_EPS)
    h = h * params["gamma"] + params["beta"]
    return h @ params["w1"].astype(jnp.float32) + params["b1"]


if __name__ == "__main__":
    # Small shapes consistent with the module:
    #   hidden_size (constructor arg) = Dh + num_classes, num_classes = 4
    B, S = 2, 8
    num_classes = 4
    Dh = 28
    hidden_size = Dh + num_classes  # 32

    key = jax.random.PRNGKey(0)
    k_hs, k_sp, k_w0, k_b0, k_g, k_be, k_w1, k_b1 = jax.random.split(key, 8)

    hidden_states = jax.random.normal(k_hs, (B, S, Dh), dtype=jnp.float32)
    # start_position: soft start-label scores, shape [B, S, num_classes]
    start_position = jax.random.normal(k_sp, (B, S, num_classes), dtype=jnp.float32)

    # Deterministic synthetic parameters (Linear weights stored as
    # (in_features, out_features)).  Non-trivial gamma/beta so the affine fold
    # is actually exercised by the check.
    params = {
        "w0": jax.random.normal(k_w0, (hidden_size, hidden_size), jnp.float32) * 0.05,
        "b0": jax.random.normal(k_b0, (hidden_size,), jnp.float32) * 0.01,
        "gamma": 1.0 + 0.1 * jax.random.normal(k_g, (hidden_size,), jnp.float32),
        "beta": 0.1 * jax.random.normal(k_be, (hidden_size,), jnp.float32),
        "w1": jax.random.normal(k_w1, (hidden_size, num_classes), jnp.float32) * 0.05,
        "b1": jax.random.normal(k_b1, (num_classes,), jnp.float32) * 0.01,
    }

    try:
        out = pooler_end_logits(hidden_states, start_position, params)
        out = jax.block_until_ready(out)
    except Exception:
        # Fallback for JAX versions that reject pipeline_mode=pl.Buffered(1)
        # on top-level pallas_call BlockSpecs: use default double-buffering.
        out = pooler_end_logits(hidden_states, start_position, params,
                                single_buffer_weights=False)
        out = jax.block_until_ready(out)

    ref = _reference(hidden_states, start_position, params)
    assert out.shape == (B, S, num_classes)
    assert jnp.allclose(out, ref, atol=1e-4, rtol=1e-4), "mismatch vs reference"

    print("KERNEL_OK")
</pallas_src>

<mosaic_0001>
module attributes {stable_mosaic.version = 11 : i64} {
  func.func @_pooler_end_logits_kernel(%arg0: i32, %arg1: memref<16x28xf32, #tpu.memory_space<vmem>>, %arg2: memref<16x4xf32, #tpu.memory_space<vmem>>, %arg3: memref<28x32xf32, #tpu.memory_space<vmem>>, %arg4: memref<4x32xf32, #tpu.memory_space<vmem>>, %arg5: memref<1x32xf32, #tpu.memory_space<vmem>>, %arg6: memref<32x4xf32, #tpu.memory_space<vmem>>, %arg7: memref<1x4xf32, #tpu.memory_space<vmem>>, %arg8: memref<16x4xf32, #tpu.memory_space<vmem>>) attributes {dimension_semantics = [#tpu.dimension_semantics<parallel>], iteration_bounds = array<i64: 1>, scalar_prefetch = 0 : i64, scratch_operands = 0 : i64, tpu.core_type = #tpu.core_type<tc>, window_params = [{transform_indices = @transform_0, window_bounds = array<i64: 16, 28>}, {transform_indices = @transform_1, window_bounds = array<i64: 16, 4>}, {pipeline_mode = #tpu.pipeline_mode<synchronous>, transform_indices = @transform_2, window_bounds = array<i64: 28, 32>}, {pipeline_mode = #tpu.pipeline_mode<synchronous>, transform_indices = @transform_3, window_bounds = array<i64: 4, 32>}, {pipeline_mode = #tpu.pipeline_mode<synchronous>, transform_indices = @transform_4, window_bounds = array<i64: 1, 32>}, {pipeline_mode = #tpu.pipeline_mode<synchronous>, transform_indices = @transform_5, window_bounds = array<i64: 32, 4>}, {pipeline_mode = #tpu.pipeline_mode<synchronous>, transform_indices = @transform_6, window_bounds = array<i64: 1, 4>}, {transform_indices = @transform_7, window_bounds = array<i64: 16, 4>}]} {
    %c0 = arith.constant 0 : index
    %c0_0 = arith.constant 0 : index
    %0 = vector.load %arg1[%c0, %c0_0] : memref<16x28xf32, #tpu.memory_space<vmem>>, vector<16x28xf32>
    %c0_1 = arith.constant 0 : index
    %c0_2 = arith.constant 0 : index
    %1 = vector.load %arg3[%c0_1, %c0_2] : memref<28x32xf32, #tpu.memory_space<vmem>>, vector<28x32xf32>
    %cst = arith.constant dense<0.000000e+00> : vector<16x32xf32>
    %2 = tpu.matmul %0, %1, %cst {dimension_numbers = #tpu.dot_dimension_numbers<[1], [0], [0], [1], [0, 0, 1, 1], [], []>} : vector<16x28xf32>, vector<28x32xf32>, vector<16x32xf32> -> vector<16x32xf32>
    %c0_3 = arith.constant 0 : index
    %c0_4 = arith.constant 0 : index
    %3 = vector.load %arg2[%c0_3, %c0_4] : memref<16x4xf32, #tpu.memory_space<vmem>>, vector<16x4xf32>
    %c0_5 = arith.constant 0 : index
    %c0_6 = arith.constant 0 : index
    %4 = vector.load %arg4[%c0_5, %c0_6] : memref<4x32xf32, #tpu.memory_space<vmem>>, vector<4x32xf32>
    %5 = vector.extract_strided_slice %3 {offsets = [0, 0], sizes = [16, 1], strides = [1, 1]} : vector<16x4xf32> to vector<16x1xf32>
    %6 = vector.extract_strided_slice %4 {offsets = [0, 0], sizes = [1, 32], strides = [1, 1]} : vector<4x32xf32> to vector<1x32xf32>
    %7 = vector.broadcast %5 : vector<16x1xf32> to vector<16x32xf32>
    %8 = vector.broadcast %6 : vector<1x32xf32> to vector<16x32xf32>
    %9 = arith.mulf %7, %8 : vector<16x32xf32>
    %10 = arith.addf %2, %9 : vector<16x32xf32>
    %11 = vector.extract_strided_slice %3 {offsets = [0, 1], sizes = [16, 1], strides = [1, 1]} : vector<16x4xf32> to vector<16x1xf32>
    %12 = vector.extract_strided_slice %4 {offsets = [1, 0], sizes = [1, 32], strides = [1, 1]} : vector<4x32xf32> to vector<1x32xf32>
    %13 = vector.broadcast %11 : vector<16x1xf32> to vector<16x32xf32>
    %14 = vector.broadcast %12 : vector<1x32xf32> to vector<16x32xf32>
    %15 = arith.mulf %13, %14 : vector<16x32xf32>
    %16 = arith.addf %10, %15 : vector<16x32xf32>
    %17 = vector.extract_strided_slice %3 {offsets = [0, 2], sizes = [16, 1], strides = [1, 1]} : vector<16x4xf32> to vector<16x1xf32>
    %18 = vector.extract_strided_slice %4 {offsets = [2, 0], sizes = [1, 32], strides = [1, 1]} : vector<4x32xf32> to vector<1x32xf32>
    %19 = vector.broadcast %17 : vector<16x1xf32> to vector<16x32xf32>
    %20 = vector.broadcast %18 : vector<1x32xf32> to vector<16x32xf32>
    %21 = arith.mulf %19, %20 : vector<16x32xf32>
    %22 = arith.addf %16, %21 : vector<16x32xf32>
    %23 = vector.extract_strided_slice %3 {offsets = [0, 3], sizes = [16, 1], strides = [1, 1]} : vector<16x4xf32> to vector<16x1xf32>
    %24 = vector.extract_strided_slice %4 {offsets = [3, 0], sizes = [1, 32], strides = [1, 1]} : vector<4x32xf32> to vector<1x32xf32>
    %25 = vector.broadcast %23 : vector<16x1xf32> to vector<16x32xf32>
    %26 = vector.broadcast %24 : vector<1x32xf32> to vector<16x32xf32>
    %27 = arith.mulf %25, %26 : vector<16x32xf32>
    %28 = arith.addf %22, %27 : vector<16x32xf32>
    %c0_7 = arith.constant 0 : index
    %c0_8 = arith.constant 0 : index
    %29 = vector.load %arg5[%c0_7, %c0_8] : memref<1x32xf32, #tpu.memory_space<vmem>>, vector<1x32xf32>
    %30 = vector.broadcast %29 : vector<1x32xf32> to vector<16x32xf32>
    %31 = arith.addf %28, %30 : vector<16x32xf32>
    %32 = math.tanh %31 : vector<16x32xf32>
    %cst_9 = arith.constant dense<0.000000e+00> : vector<16xf32>
    %33 = vector.multi_reduction <add>, %32, %cst_9 [1] : vector<16x32xf32> to vector<16xf32>
    %34 = vector.shape_cast %33 : vector<16xf32> to vector<16x1xf32>
    %35 = arith.mulf %32, %32 : vector<16x32xf32>
    %cst_10 = arith.constant dense<0.000000e+00> : vector<16xf32>
    %36 = vector.multi_reduction <add>, %35, %cst_10 [1] : vector<16x32xf32> to vector<16xf32>
    %37 = vector.shape_cast %36 : vector<16xf32> to vector<16x1xf32>
    %cst_11 = arith.constant 3.125000e-02 : f32
    %38 = vector.broadcast %cst_11 : f32 to vector<16x1xf32>
    %39 = arith.mulf %34, %38 : vector<16x1xf32>
    %cst_12 = arith.constant 3.125000e-02 : f32
    %40 = vector.broadcast %cst_12 : f32 to vector<16x1xf32>
    %41 = arith.mulf %37, %40 : vector<16x1xf32>
    %42 = arith.mulf %39, %39 : vector<16x1xf32>
    %43 = arith.subf %41, %42 : vector<16x1xf32>
    %cst_13 = arith.constant 0.000000e+00 : f32
    %44 = vector.broadcast %cst_13 : f32 to vector<16x1xf32>
    %45 = arith.maximumf %43, %44 : vector<16x1xf32>
    %46 = vector.broadcast %39 : vector<16x1xf32> to vector<16x32xf32>
    %47 = arith.subf %32, %46 : vector<16x32xf32>
    %cst_14 = arith.constant 9.99999974E-6 : f32
    %48 = vector.broadcast %cst_14 : f32 to vector<16x1xf32>
    %49 = arith.addf %45, %48 : vector<16x1xf32>
    %50 = math.rsqrt %49 : vector<16x1xf32>
    %51 = vector.broadcast %50 : vector<16x1xf32> to vector<16x32xf32>
    %52 = arith.mulf %47, %51 : vector<16x32xf32>
    %c0_15 = arith.constant 0 : index
    %c0_16 = arith.constant 0 : index
    %53 = vector.load %arg6[%c0_15, %c0_16] : memref<32x4xf32, #tpu.memory_space<vmem>>, vector<32x4xf32>
    %cst_17 = arith.constant dense<0.000000e+00> : vector<16x4xf32>
    %54 = tpu.matmul %52, %53, %cst_17 {dimension_numbers = #tpu.dot_dimension_numbers<[1], [0], [0], [1], [0, 0, 1, 1], [], []>} : vector<16x32xf32>, vector<32x4xf32>, vector<16x4xf32> -> vector<16x4xf32>
    %c0_18 = arith.constant 0 : index
    %c0_19 = arith.constant 0 : index
    %55 = vector.load %arg7[%c0_18, %c0_19] : memref<1x4xf32, #tpu.memory_space<vmem>>, vector<1x4xf32>
    %56 = vector.broadcast %55 : vector<1x4xf32> to vector<16x4xf32>
    %57 = arith.addf %54, %56 : vector<16x4xf32>
    %c0_20 = arith.constant 0 : index
    %c0_21 = arith.constant 0 : index
    %58 = vector.load %arg8[%c0_20, %c0_21] : memref<16x4xf32, #tpu.memory_space<vmem>>, vector<16x4xf32>
    tpu.vector_store %arg8[%c0_20, %c0_21], %57 {strides = array<i32>} : memref<16x4xf32, #tpu.memory_space<vmem>>, vector<16x4xf32>,
    return
  }
  func.func @transform_0(%arg0: i32) -> (i32, i32) {
    %c0_i32 = arith.constant 0 : i32
    %c0_i32_0 = arith.constant 0 : i32
    return %arg0, %c0_i32 : i32, i32
  }
  func.func @transform_1(%arg0: i32) -> (i32, i32) {
    %c0_i32 = arith.constant 0 : i32
    %c0_i32_0 = arith.constant 0 : i32
    return %arg0, %c0_i32 : i32, i32
  }
  func.func @transform_2(%arg0: i32) -> (i32, i32) {
    %c0_i32 = arith.constant 0 : i32
    %c0_i32_0 = arith.constant 0 : i32
    %c0_i32_1 = arith.constant 0 : i32
    return %c0_i32, %c0_i32_0 : i32, i32
  }
  func.func @transform_3(%arg0: i32) -> (i32, i32) {
    %c0_i32 = arith.constant 0 : i32
    %c0_i32_0 = arith.constant 0 : i32
    %c0_i32_1 = arith.constant 0 : i32
    return %c0_i32, %c0_i32_0 : i32, i32
  }
  func.func @transform_4(%arg0: i32) -> (i32, i32) {
    %c0_i32 = arith.constant 0 : i32
    %c0_i32_0 = arith.constant 0 : i32
    %c0_i32_1 = arith.constant 0 : i32
    return %c0_i32, %c0_i32_0 : i32, i32
  }
  func.func @transform_5(%arg0: i32) -> (i32, i32) {
    %c0_i32 = arith.constant 0 : i32
    %c0_i32_0 = arith.constant 0 : i32
    %c0_i32_1 = arith.constant 0 : i32
    return %c0_i32, %c0_i32_0 : i32, i32
  }
  func.func @transform_6(%arg0: i32) -> (i32, i32) {
    %c0_i32 = arith.constant 0 : i32
    %c0_i32_0 = arith.constant 0 : i32
    %c0_i32_1 = arith.constant 0 : i32
    return %c0_i32, %c0_i32_0 : i32, i32
  }
  func.func @transform_7(%arg0: i32) -> (i32, i32) {
    %c0_i32 = arith.constant 0 : i32
    %c0_i32_0 = arith.constant 0 : i32
    return %arg0, %c0_i32 : i32, i32
  }
}

module attributes {stable_mosaic.version = 11 : i64} {
  func.func @_pooler_end_logits_kernel(%arg0: i32, %arg1: memref<16x28xf32, #tpu.memory_space<vmem>>, %arg2: memref<16x4xf32, #tpu.memory_space<vmem>>, %arg3: memref<28x32xf32, #tpu.memory_space<vmem>>, %arg4: memref<4x32xf32, #tpu.memory_space<vmem>>, %arg5: memref<1x32xf32, #tpu.memory_space<vmem>>, %arg6: memref<32x4xf32, #tpu.memory_space<vmem>>, %arg7: memref<1x4xf32, #tpu.memory_space<vmem>>, %arg8: memref<16x4xf32, #tpu.memory_space<vmem>>) attributes {dimension_semantics = [#tpu.dimension_semantics<parallel>], iteration_bounds = array<i64: 1>, scalar_prefetch = 0 : i64, scratch_operands = 0 : i64, tpu.core_type = #tpu.core_type<tc>, window_params = [{transform_indices = @transform_0, window_bounds = array<i64: 16, 28>}, {transform_indices = @transform_1, window_bounds = array<i64: 16, 4>}, {pipeline_mode = #tpu.pipeline_mode<synchronous>, transform_indices = @transform_2, window_bounds = array<i64: 28, 32>}, {pipeline_mode = #tpu.pipeline_mode<synchronous>, transform_indices = @transform_3, window_bounds = array<i64: 4, 32>}, {pipeline_mode = #tpu.pipeline_mode<synchronous>, transform_indices = @transform_4, window_bounds = array<i64: 1, 32>}, {pipeline_mode = #tpu.pipeline_mode<synchronous>, transform_indices = @transform_5, window_bounds = array<i64: 32, 4>}, {pipeline_mode = #tpu.pipeline_mode<synchronous>, transform_indices = @transform_6, window_bounds = array<i64: 1, 4>}, {transform_indices = @transform_7, window_bounds = array<i64: 16, 4>}]} {
    %c0 = arith.constant 0 : index
    %c0_0 = arith.constant 0 : index
    %0 = vector.load %arg1[%c0, %c0_0] : memref<16x28xf32, #tpu.memory_space<vmem>>, vector<16x28xf32>
    %c0_1 = arith.constant 0 : index
    %c0_2 = arith.constant 0 : index
    %1 = vector.load %arg3[%c0_1, %c0_2] : memref<28x32xf32, #tpu.memory_space<vmem>>, vector<28x32xf32>
    %cst = arith.constant dense<0.000000e+00> : vector<16x32xf32>
    %2 = tpu.matmul %0, %1, %cst {dimension_numbers = #tpu.dot_dimension_numbers<[1], [0], [0], [1], [0, 0, 1, 1], [], []>} : vector<16x28xf32>, vector<28x32xf32>, vector<16x32xf32> -> vector<16x32xf32>
    %c0_3 = arith.constant 0 : index
    %c0_4 = arith.constant 0 : index
    %3 = vector.load %arg2[%c0_3, %c0_4] : memref<16x4xf32, #tpu.memory_space<vmem>>, vector<16x4xf32>
    %c0_5 = arith.constant 0 : index
    %c0_6 = arith.constant 0 : index
    %4 = vector.load %arg4[%c0_5, %c0_6] : memref<4x32xf32, #tpu.memory_space<vmem>>, vector<4x32xf32>
    %5 = vector.extract_strided_slice %3 {offsets = [0, 0], sizes = [16, 1], strides = [1, 1]} : vector<16x4xf32> to vector<16x1xf32>
    %6 = vector.extract_strided_slice %4 {offsets = [0, 0], sizes = [1, 32], strides = [1, 1]} : vector<4x32xf32> to vector<1x32xf32>
    %7 = vector.broadcast %5 : vector<16x1xf32> to vector<16x32xf32>
    %8 = vector.broadcast %6 : vector<1x32xf32> to vector<16x32xf32>
    %9 = arith.mulf %7, %8 : vector<16x32xf32>
    %10 = arith.addf %2, %9 : vector<16x32xf32>
    %11 = vector.extract_strided_slice %3 {offsets = [0, 1], sizes = [16, 1], strides = [1, 1]} : vector<16x4xf32> to vector<16x1xf32>
    %12 = vector.extract_strided_slice %4 {offsets = [1, 0], sizes = [1, 32], strides = [1, 1]} : vector<4x32xf32> to vector<1x32xf32>
    %13 = vector.broadcast %11 : vector<16x1xf32> to vector<16x32xf32>
    %14 = vector.broadcast %12 : vector<1x32xf32> to vector<16x32xf32>
    %15 = arith.mulf %13, %14 : vector<16x32xf32>
    %16 = arith.addf %10, %15 : vector<16x32xf32>
    %17 = vector.extract_strided_slice %3 {offsets = [0, 2], sizes = [16, 1], strides = [1, 1]} : vector<16x4xf32> to vector<16x1xf32>
    %18 = vector.extract_strided_slice %4 {offsets = [2, 0], sizes = [1, 32], strides = [1, 1]} : vector<4x32xf32> to vector<1x32xf32>
    %19 = vector.broadcast %17 : vector<16x1xf32> to vector<16x32xf32>
    %20 = vector.broadcast %18 : vector<1x32xf32> to vector<16x32xf32>
    %21 = arith.mulf %19, %20 : vector<16x32xf32>
    %22 = arith.addf %16, %21 : vector<16x32xf32>
    %23 = vector.extract_strided_slice %3 {offsets = [0, 3], sizes = [16, 1], strides = [1, 1]} : vector<16x4xf32> to vector<16x1xf32>
    %24 = vector.extract_strided_slice %4 {offsets = [3, 0], sizes = [1, 32], strides = [1, 1]} : vector<4x32xf32> to vector<1x32xf32>
    %25 = vector.broadcast %23 : vector<16x1xf32> to vector<16x32xf32>
    %26 = vector.broadcast %24 : vector<1x32xf32> to vector<16x32xf32>
    %27 = arith.mulf %25, %26 : vector<16x32xf32>
    %28 = arith.addf %22, %27 : vector<16x32xf32>
    %c0_7 = arith.constant 0 : index
    %c0_8 = arith.constant 0 : index
    %29 = vector.load %arg5[%c0_7, %c0_8] : memref<1x32xf32, #tpu.memory_space<vmem>>, vector<1x32xf32>
    %30 = vector.broadcast %29 : vector<1x32xf32> to vector<16x32xf32>
    %31 = arith.addf %28, %30 : vector<16x32xf32>
    %32 = math.tanh %31 : vector<16x32xf32>
    %cst_9 = arith.constant dense<0.000000e+00> : vector<16xf32>
    %33 = vector.multi_reduction <add>, %32, %cst_9 [1] : vector<16x32xf32> to vector<16xf32>
    %34 = vector.shape_cast %33 : vector<16xf32> to vector<16x1xf32>
    %35 = arith.mulf %32, %32 : vector<16x32xf32>
    %cst_10 = arith.constant dense<0.000000e+00> : vector<16xf32>
    %36 = vector.multi_reduction <add>, %35, %cst_10 [1] : vector<16x32xf32> to vector<16xf32>
    %37 = vector.shape_cast %36 : vector<16xf32> to vector<16x1xf32>
    %cst_11 = arith.constant 3.125000e-02 : f32
    %38 = vector.broadcast %cst_11 : f32 to vector<16x1xf32>
    %39 = arith.mulf %34, %38 : vector<16x1xf32>
    %cst_12 = arith.constant 3.125000e-02 : f32
    %40 = vector.broadcast %cst_12 : f32 to vector<16x1xf32>
    %41 = arith.mulf %37, %40 : vector<16x1xf32>
    %42 = arith.mulf %39, %39 : vector<16x1xf32>
    %43 = arith.subf %41, %42 : vector<16x1xf32>
    %cst_13 = arith.constant 0.000000e+00 : f32
    %44 = vector.broadcast %cst_13 : f32 to vector<16x1xf32>
    %45 = arith.maximumf %43, %44 : vector<16x1xf32>
    %46 = vector.broadcast %39 : vector<16x1xf32> to vector<16x32xf32>
    %47 = arith.subf %32, %46 : vector<16x32xf32>
    %cst_14 = arith.constant 9.99999974E-6 : f32
    %48 = vector.broadcast %cst_14 : f32 to vector<16x1xf32>
    %49 = arith.addf %45, %48 : vector<16x1xf32>
    %50 = math.rsqrt %49 : vector<16x1xf32>
    %51 = vector.broadcast %50 : vector<16x1xf32> to vector<16x32xf32>
    %52 = arith.mulf %47, %51 : vector<16x32xf32>
    %c0_15 = arith.constant 0 : index
    %c0_16 = arith.constant 0 : index
    %53 = vector.load %arg6[%c0_15, %c0_16] : memref<32x4xf32, #tpu.memory_space<vmem>>, vector<32x4xf32>
    %cst_17 = arith.constant dense<0.000000e+00> : vector<16x4xf32>
    %54 = tpu.matmul %52, %53, %cst_17 {dimension_numbers = #tpu.dot_dimension_numbers<[1], [0], [0], [1], [0, 0, 1, 1], [], []>} : vector<16x32xf32>, vector<32x4xf32>, vector<16x4xf32> -> vector<16x4xf32>
    %c0_18 = arith.constant 0 : index
    %c0_19 = arith.constant 0 : index
    %55 = vector.load %arg7[%c0_18, %c0_19] : memref<1x4xf32, #tpu.memory_space<vmem>>, vector<1x4xf32>
    %56 = vector.broadcast %55 : vector<1x4xf32> to vector<16x4xf32>
    %57 = arith.addf %54, %56 : vector<16x4xf32>
    %c0_20 = arith.constant 0 : index
    %c0_21 = arith.constant 0 : index
    %58 = vector.load %arg8[%c0_20, %c0_21] : memref<16x4xf32, #tpu.memory_space<vmem>>, vector<16x4xf32>
    tpu.vector_store %arg8[%c0_20, %c0_21], %57 {strides = array<i32>} : memref<16x4xf32, #tpu.memory_space<vmem>>, vector<16x4xf32>,
    return
  }
  func.func @transform_0(%arg0: i32) -> (i32, i32) {
    %c0_i32 = arith.constant 0 : i32
    %c0_i32_0 = arith.constant 0 : i32
    return %arg0, %c0_i32 : i32, i32
  }
  func.func @transform_1(%arg0: i32) -> (i32, i32) {
    %c0_i32 = arith.constant 0 : i32
    %c0_i32_0 = arith.constant 0 : i32
    return %arg0, %c0_i32 : i32, i32
  }
  func.func @transform_2(%arg0: i32) -> (i32, i32) {
    %c0_i32 = arith.constant 0 : i32
    %c0_i32_0 = arith.constant 0 : i32
    %c0_i32_1 = arith.constant 0 : i32
    return %c0_i32, %c0_i32_0 : i32, i32
  }
  func.func @transform_3(%arg0: i32) -> (i32, i32) {
    %c0_i32 = arith.constant 0 : i32
    %c0_i32_0 = arith.constant 0 : i32
    %c0_i32_1 = arith.constant 0 : i32
    return %c0_i32, %c0_i32_0 : i32, i32
  }
  func.func @transform_4(%arg0: i32) -> (i32, i32) {
    %c0_i32 = arith.constant 0 : i32
    %c0_i32_0 = arith.constant 0 : i32
    %c0_i32_1 = arith.constant 0 : i32
    return %c0_i32, %c0_i32_0 : i32, i32
  }
  func.func @transform_5(%arg0: i32) -> (i32, i32) {
    %c0_i32 = arith.constant 0 : i32
    %c0_i32_0 = arith.constant 0 : i32
    %c0_i32_1 = arith.constant 0 : i32
    return %c0_i32, %c0_i32_0 : i32, i32
  }
  func.func @transform_6(%arg0: i32) -> (i32, i32) {
    %c0_i32 = arith.constant 0 : i32
    %c0_i32_0 = arith.constant 0 : i32
    %c0_i32_1 = arith.constant 0 : i32
    return %c0_i32, %c0_i32_0 : i32, i32
  }
  func.func @transform_7(%arg0: i32) -> (i32, i32) {
    %c0_i32 = arith.constant 0 : i32
    %c0_i32_0 = arith.constant 0 : i32
    return %arg0, %c0_i32 : i32, i32
  }
}

</mosaic_0001>

<bundles_post_ra>
// kernel: pooler_end_logits.1
= control target key start
LH: loop header
LB: loop body
LE: loop exit
PB: predicated region body
PF: predicated region fallthrough
CT: control target
= control target key end

     0   :  { %vm58_vm0 = vcmask 1043456   ;;  %vm51_vm1 = vcmask 228352   ;;  %v387_v2 = vmov 1   ;;  %v388_v3 = vmov 0   ;;  %s490_s2 = inlined_call_operand.vmem [shape: f32[28,32], index: 2, kind: input, shape index: {}]   ;;  %s491_s0 = inlined_call_operand.vmem [shape: f32[16,28], index: 0, kind: input, shape index: {}]   ;;  %s492_s1 = inlined_call_operand.vmem [shape: f32[16,4], index: 1, kind: input, shape index: {}]   ;;  %s493_s3 = inlined_call_operand.vmem [shape: f32[4,32], index: 3, kind: input, shape index: {}]   ;;  %s494_s4 = inlined_call_operand.vmem [shape: f32[1,32], index: 4, kind: input, shape index: {}]   ;;  %s495_s5 = inlined_call_operand.vmem [shape: f32[32,4], index: 5, kind: input, shape index: {}]   ;;  %s496_s6 = inlined_call_operand.vmem [shape: f32[1,4], index: 6, kind: input, shape index: {}]   ;;  %s497_s7 = inlined_call_operand.vmem [shape: f32[16,4], index: 7, kind: output, shape index: {}]  }
   0x1   :  { %v31_v0 = vld [vmem:[%s490_s2 + $0x18] sm:$0xf]  ;;  %v30_v1 = vld [vmem:[%s490_s2 + $0x10] sm:$0xff]  ;;  %374 = vset.pattern.permute.xlu1 %v387_v2  ;;  %373 = vset.pattern.permute.xlu0 %v388_v3  ;;  %v26_v4 = vld [vmem:[%s491_s0] sm:$0xff]  ;;  %v389_v10 = vmov 2   ;;  %v390_v11 = vmov 3   ;;  %v45_v12 = vlaneseq }
   0x2   :  { %347 = vmatprep.subr.msk.mxu0 %vm58_vm0, %v31_v0  ;;  %v29_v5 = vld [vmem:[%s490_s2 + $0x8] sm:$0xff]  ;;  %355 = vmatprep.mubr.msk.f32.mxu0 %vm51_vm1, %v26_v4  ;;  %v32_v6 = vld [vmem:[%s492_s1] sm:$0xff]  ;;  %vm196_vm2 = vcmask 261120   ;;  %v232_v60 = vld [vmem:[%s495_s5 + $0x18] sm:$0xff]  ;;  %vm321_vm3 = vcmask 31744  }
   0x3   :  { %348 = vmatpush3.msk.msra.mxu0 %vm58_vm0, %v31_v0  ;;  %138 = vperm.xlu1 %374, %v32_v6   ;;  %v28_v7 = vld [vmem:[%s490_s2] sm:$0xff]  ;;  %v33_v8 = vld [vmem:[%s492_s1 + $0x8] sm:$0xff]  ;;  %v46_v15 = vshrl.u32 %v45_v12, 7  ;;  %v231_v61 = vld [vmem:[%s495_s5 + $0x10] sm:$0xff] }
   0x4   :  { %349 = vmatprep.subr.mxu0 %v30_v1  ;;  %37 = vperm.xlu0 %373, %v32_v6   ;;  %v27_v9 = vld [vmem:[%s491_s0 + $0x8] sm:$0xff]  ;;  %v34_v18 = vld [vmem:[%s493_s3] sm:$0xf] }
   0x5   :  { %350 = vmatpush3.msra.mxu0 %v30_v1  ;;  %v47_v17 = vsub.s32 0, %v46_v15  ;;  %v147_v20 = vsub.s32 1, %v46_v15  ;;  %v163_v21 = vsub.s32 2, %v46_v15  ;;  %v179_v24 = vsub.s32 3, %v46_v15  ;;  %v331_v46 = vld [vmem:[%s494_s4] ss:$0 sm:$0xff]  ;;  %358 = vmatprep.subr.mxu1 %v232_v60 }
   0x6   :  { %351 = vmatprep.subr.mxu0 %v29_v5  ;;  %359 = vmatpush3.msra.mxu1 %v232_v60  ;;  %v230_v62 = vld [vmem:[%s495_s5 + $0x8] sm:$0xff]  ;;  %v229_v63 = vld [vmem:[%s495_s5] sm:$0xff] }
   0x7   :  { %352 = vmatpush3.msra.mxu0 %v29_v5  ;;  %142 = vperm.xlu1 %374, %v33_v8   ;;  %v48_v23 = vrot.slane %v34_v18, %v47_v17  ;;  %v148_v26 = vrot.slane %v34_v18, %v147_v20  ;;  %v164_v27 = vrot.slane %v34_v18, %v163_v21 }
   0x8   :  { %353 = vmatprep.subr.mxu0 %v28_v7  ;;  %42 = vperm.xlu0 %373, %v33_v8   ;;  %v180_v29 = vrot.slane %v34_v18, %v179_v24 }
   0x9   :  { %354 = vmatpush3.msra.mxu0 %v28_v7  ;;  %360 = vmatprep.subr.mxu1 %v231_v61 }
   0xa   :  { %356 = vmatmul.mubr.msk.f32.vlgmr.msra.gmra.mxu0 %vm51_vm1, %v27_v9  ;;  %361 = vmatpush3.msra.mxu1 %v231_v61 }
   0xb   :  { %376 = vset.pattern.permute.xlu1 %v389_v10  ;;  %362 = vmatprep.subr.mxu1 %v230_v62 }
   0xc   :  { %375 = vset.pattern.permute.xlu0 %v389_v10  ;;  %158 = vperm.xlu1 %376, %v33_v8  }
   0xd   :  { %154 = vperm.xlu0 %375, %v32_v6   ;;  %363 = vmatpush3.msra.mxu1 %v230_v62 }
   0xe   :  { %364 = vmatprep.subr.mxu1 %v229_v63 }
   0xf   :  { %365 = vmatpush3.msra.mxu1 %v229_v63 }
  0x10   :  { %377 = vset.pattern.permute.xlu1 %v390_v11 }
  0x11   :  { %378 = vset.pattern.permute.xlu0 %v390_v11  ;;  %170 = vperm.xlu1 %377, %v32_v6  }
  0x12   :  { %174 = vperm.xlu0 %378, %v33_v8  }
  0x7e   :  { %v139_v14 = vpop.permute.xlu1 %138 }
  0x7f   :  { %v38_v13 = vpop.permute.xlu0 %37  ;;  %v149_v38 = vmul.f32 %v148_v26, %v139_v14 }
  0x80   :  { %v49_v32 = vmul.f32 %v48_v23, %v38_v13 }
  0x82   :  { %v143_v19 = vpop.permute.xlu1 %142 }
  0x83   :  { %v43_v16 = vpop.permute.xlu0 %42  ;;  %v150_v33 = vmul.f32 %v148_v26, %v143_v19 }
  0x84   :  { %v50_v28 = vmul.f32 %v48_v23, %v43_v16 }
  0x87   :  { %v159_v25 = vpop.permute.xlu1 %158 }
  0x88   :  { %v155_v22 = vpop.permute.xlu0 %154  ;;  %v166_v35 = vmul.f32 %v164_v27, %v159_v25 }
  0x89   :  { %v165_v42 = vmul.f32 %v164_v27, %v155_v22  ;;  %v332_v22 = vld [vmem:[%s496_s6] ss:$0 sm:$0xff] }
  0x8c   :  { %v171_v37 = vpop.permute.xlu1 %170 }
  0x8d   :  { %v175_v31 = vpop.permute.xlu0 %174  ;;  %v181_v45 = vmul.f32 %v180_v29, %v171_v37 }
  0x8e   :  { %v182_v41 = vmul.f32 %v180_v29, %v175_v31 }
  0xca   :  { %v357_v30 = vpop.f32.mrf.mxu0 }
  0xcb   :  { %v134_v34 = vadd.f32 %v357_v30, %v50_v28 }
  0xcc   :  { %v128_v36 = vpop.f32.mrf.mxu0 }
  0xcd   :  { %v152_v39 = vadd.f32 %v150_v33, %v134_v34  ;;  %v129_v40 = vadd.f32 %v128_v36, %v49_v32 }
  0xcf   :  { %v168_v43 = vadd.f32 %v166_v35, %v152_v39  ;;  %v151_v44 = vadd.f32 %v149_v38, %v129_v40 }
  0xd1   :  { %v184_v47 = vadd.f32 %v182_v41, %v168_v43  ;;  %v167_v48 = vadd.f32 %v165_v42, %v151_v44 }
  0xd3   :  { %v193_v49 = vadd.f32 %v331_v46, %v184_v47  ;;  %v183_v50 = vadd.f32 %v181_v45, %v167_v48 }
  0xd5   :  { %379 = vtanh.f32 %v193_v49  ;;  %v192_v51 = vadd.f32 %v331_v46, %v183_v50 }
  0xd7   :  { %381 = vtanh.f32 %v192_v51 }
  0xe2   :  { %v380_v52 = vpop.eup %379 }
  0xe3   :  { %v200_v53 = vsel %vm196_vm2, %v380_v52, 0.0  ;;  %v204_v54 = vmul.f32 %v380_v52, %v380_v52 }
  0xe4   :  { %v382_v55 = vpop.eup %381  ;;  %201 = vadd.xlane.f32.xlu0 %v200_v53 }
  0xe5   :  { %v197_v56 = vsel %vm196_vm2, %v382_v55, 0.0  ;;  %v203_v57 = vmul.f32 %v382_v55, %v382_v55  ;;  %v208_v58 = vsel %vm196_vm2, %v204_v54, 0.0 }
  0xe6   :  { %198 = vadd.xlane.f32.xlu1 %v197_v56 }
  0xe7   :  { %v205_v59 = vsel %vm196_vm2, %v203_v57, 0.0 }
  0xe8   :  { %209 = vadd.xlane.f32.xlu0 %v208_v58 }
  0xea   :  { %206 = vadd.xlane.f32.xlu1 %v205_v59 }
 0x16d   :  { %v202_v0 = vpop.xlane.xlu0 %201 }
 0x16e   :  { %v212_v1 = vmul.f32 0.03125, %v202_v0 }
 0x16f   :  { %v199_v2 = vpop.xlane.xlu1 %198 }
 0x170   :  { %v211_v3 = vmul.f32 0.03125, %v199_v2  ;;  %v216_v5 = vmul.f32 %v212_v1, %v212_v1  ;;  %v222_v19 = vsub.f32 %v380_v52, %v212_v1 }
 0x171   :  { %v210_v4 = vpop.xlane.xlu0 %209 }
 0x172   :  { %v214_v6 = vmul.f32 0.03125, %v210_v4  ;;  %v215_v8 = vmul.f32 %v211_v3, %v211_v3  ;;  %v221_v17 = vsub.f32 %v382_v55, %v211_v3 }
 0x173   :  { %v207_v7 = vpop.xlane.xlu1 %206 }
 0x174   :  { %v218_v9 = vsub.f32 %v214_v6, %v216_v5  ;;  %v213_v10 = vmul.f32 0.03125, %v207_v7 }
 0x176   :  { %v220_v11 = vmax.f32 %v218_v9, 0.0  ;;  %v217_v12 = vsub.f32 %v213_v10, %v215_v8 }
 0x178   :  { %v224_v13 = vadd.f32 1e-05, %v220_v11  ;;  %v219_v14 = vmax.f32 %v217_v12, 0.0 }
 0x17a   :  { %v223_v15 = vadd.f32 1e-05, %v219_v14  ;;  %383 = vrsqrt.f32 %v224_v13 }
 0x17c   :  { %385 = vrsqrt.f32 %v223_v15 }
 0x187   :  { %v384_v16 = vpop.eup %383 }
 0x188   :  { %v228_v21 = vmul.f32 %v384_v16, %v222_v19 }
 0x189   :  { %v386_v18 = vpop.eup %385 }
 0x18a   :  { %v227_v20 = vmul.f32 %v386_v18, %v221_v17 }
 0x18c   :  { %366 = vmatprep.mubr.msk.f32.mxu1 %vm196_vm2, %v227_v20 }
 0x18d   :  { %367 = vmatmul.mubr.msk.f32.vlgmr.msra.gmra.mxu1 %vm196_vm2, %v228_v21 }
 0x24d   :  { %v368_v23 = vpop.f32.mrf.mxu1 }
 0x24e   :  { %v318_v24 = vadd.f32 %v368_v23, %v332_v22 }
 0x24f   :  { %v312_v25 = vpop.f32.mrf.mxu1 }
 0x250   :  { %323 = vst.msk [vmem:[%s497_s7 + $0x8] sm:$0xff] %vm321_vm3, %v318_v24  ;;  %v313_v26 = vadd.f32 %v332_v22, %v312_v25 }
 0x252   :  { %322 = vst.msk [vmem:[%s497_s7] sm:$0xff] %vm321_vm3, %v313_v26 }

// kernel: pooler_end_logits.1
= control target key start
LH: loop header
LB: loop body
LE: loop exit
PB: predicated region body
PF: predicated region fallthrough
CT: control target
= control target key end

     0   :  { %vm58_vm0 = vcmask 1043456   ;;  %vm51_vm1 = vcmask 228352   ;;  %v387_v2 = vmov 1   ;;  %v388_v3 = vmov 0   ;;  %s490_s2 = inlined_call_operand.vmem [shape: f32[28,32], index: 2, kind: input, shape index: {}]   ;;  %s491_s0 = inlined_call_operand.vmem [shape: f32[16,28], index: 0, kind: input, shape index: {}]   ;;  %s492_s1 = inlined_call_operand.vmem [shape: f32[16,4], index: 1, kind: input, shape index: {}]   ;;  %s493_s3 = inlined_call_operand.vmem [shape: f32[4,32], index: 3, kind: input, shape index: {}]   ;;  %s494_s4 = inlined_call_operand.vmem [shape: f32[1,32], index: 4, kind: input, shape index: {}]   ;;  %s495_s5 = inlined_call_operand.vmem [shape: f32[32,4], index: 5, kind: input, shape index: {}]   ;;  %s496_s6 = inlined_call_operand.vmem [shape: f32[1,4], index: 6, kind: input, shape index: {}]   ;;  %s497_s7 = inlined_call_operand.vmem [shape: f32[16,4], index: 7, kind: output, shape index: {}]  }
   0x1   :  { %v31_v0 = vld [vmem:[%s490_s2 + $0x18] sm:$0xf]  ;;  %v30_v1 = vld [vmem:[%s490_s2 + $0x10] sm:$0xff]  ;;  %374 = vset.pattern.permute.xlu1 %v387_v2  ;;  %373 = vset.pattern.permute.xlu0 %v388_v3  ;;  %v26_v4 = vld [vmem:[%s491_s0] sm:$0xff]  ;;  %v389_v10 = vmov 2   ;;  %v390_v11 = vmov 3   ;;  %v45_v12 = vlaneseq }
   0x2   :  { %347 = vmatprep.subr.msk.mxu0 %vm58_vm0, %v31_v0  ;;  %v29_v5 = vld [vmem:[%s490_s2 + $0x8] sm:$0xff]  ;;  %355 = vmatprep.mubr.msk.f32.mxu0 %vm51_vm1, %v26_v4  ;;  %v32_v6 = vld [vmem:[%s492_s1] sm:$0xff]  ;;  %vm196_vm2 = vcmask 261120   ;;  %v232_v60 = vld [vmem:[%s495_s5 + $0x18] sm:$0xff]  ;;  %vm321_vm3 = vcmask 31744  }
   0x3   :  { %348 = vmatpush3.msk.msra.mxu0 %vm58_vm0, %v31_v0  ;;  %138 = vperm.xlu1 %374, %v32_v6   ;;  %v28_v7 = vld [vmem:[%s490_s2] sm:$0xff]  ;;  %v33_v8 = vld [vmem:[%s492_s1 + $0x8] sm:$0xff]  ;;  %v46_v15 = vshrl.u32 %v45_v12, 7  ;;  %v231_v61 = vld [vmem:[%s495_s5 + $0x10] sm:$0xff] }
   0x4   :  { %349 = vmatprep.subr.mxu0 %v30_v1  ;;  %37 = vperm.xlu0 %373, %v32_v6   ;;  %v27_v9 = vld [vmem:[%s491_s0 + $0x8] sm:$0xff]  ;;  %v34_v18 = vld [vmem:[%s493_s3] sm:$0xf] }
   0x5   :  { %350 = vmatpush3.msra.mxu0 %v30_v1  ;;  %v47_v17 = vsub.s32 0, %v46_v15  ;;  %v147_v20 = vsub.s32 1, %v46_v15  ;;  %v163_v21 = vsub.s32 2, %v46_v15  ;;  %v179_v24 = vsub.s32 3, %v46_v15  ;;  %v331_v46 = vld [vmem:[%s494_s4] ss:$0 sm:$0xff]  ;;  %358 = vmatprep.subr.mxu1 %v232_v60 }
   0x6   :  { %351 = vmatprep.subr.mxu0 %v29_v5  ;;  %359 = vmatpush3.msra.mxu1 %v232_v60  ;;  %v230_v62 = vld [vmem:[%s495_s5 + $0x8] sm:$0xff]  ;;  %v229_v63 = vld [vmem:[%s495_s5] sm:$0xff] }
   0x7   :  { %352 = vmatpush3.msra.mxu0 %v29_v5  ;;  %142 = vperm.xlu1 %374, %v33_v8   ;;  %v48_v23 = vrot.slane %v34_v18, %v47_v17  ;;  %v148_v26 = vrot.slane %v34_v18, %v147_v20  ;;  %v164_v27 = vrot.slane %v34_v18, %v163_v21 }
   0x8   :  { %353 = vmatprep.subr.mxu0 %v28_v7  ;;  %42 = vperm.xlu0 %373, %v33_v8   ;;  %v180_v29 = vrot.slane %v34_v18, %v179_v24 }
   0x9   :  { %354 = vmatpush3.msra.mxu0 %v28_v7  ;;  %360 = vmatprep.subr.mxu1 %v231_v61 }
   0xa   :  { %356 = vmatmul.mubr.msk.f32.vlgmr.msra.gmra.mxu0 %vm51_vm1, %v27_v9  ;;  %361 = vmatpush3.msra.mxu1 %v231_v61 }
   0xb   :  { %376 = vset.pattern.permute.xlu1 %v389_v10  ;;  %362 = vmatprep.subr.mxu1 %v230_v62 }
   0xc   :  { %375 = vset.pattern.permute.xlu0 %v389_v10  ;;  %158 = vperm.xlu1 %376, %v33_v8  }
   0xd   :  { %154 = vperm.xlu0 %375, %v32_v6   ;;  %363 = vmatpush3.msra.mxu1 %v230_v62 }
   0xe   :  { %364 = vmatprep.subr.mxu1 %v229_v63 }
   0xf   :  { %365 = vmatpush3.msra.mxu1 %v229_v63 }
  0x10   :  { %377 = vset.pattern.permute.xlu1 %v390_v11 }
  0x11   :  { %378 = vset.pattern.permute.xlu0 %v390_v11  ;;  %170 = vperm.xlu1 %377, %v32_v6  }
  0x12   :  { %174 = vperm.xlu0 %378, %v33_v8  }
  0x7e   :  { %v139_v14 = vpop.permute.xlu1 %138 }
  0x7f   :  { %v38_v13 = vpop.permute.xlu0 %37  ;;  %v149_v38 = vmul.f32 %v148_v26, %v139_v14 }
  0x80   :  { %v49_v32 = vmul.f32 %v48_v23, %v38_v13 }
  0x82   :  { %v143_v19 = vpop.permute.xlu1 %142 }
  0x83   :  { %v43_v16 = vpop.permute.xlu0 %42  ;;  %v150_v33 = vmul.f32 %v148_v26, %v143_v19 }
  0x84   :  { %v50_v28 = vmul.f32 %v48_v23, %v43_v16 }
  0x87   :  { %v159_v25 = vpop.permute.xlu1 %158 }
  0x88   :  { %v155_v22 = vpop.permute.xlu0 %154  ;;  %v166_v35 = vmul.f32 %v164_v27, %v159_v25 }
  0x89   :  { %v165_v42 = vmul.f32 %v164_v27, %v155_v22  ;;  %v332_v22 = vld [vmem:[%s496_s6] ss:$0 sm:$0xff] }
  0x8c   :  { %v171_v37 = vpop.permute.xlu1 %170 }
  0x8d   :  { %v175_v31 = vpop.permute.xlu0 %174  ;;  %v181_v45 = vmul.f32 %v180_v29, %v171_v37 }
  0x8e   :  { %v182_v41 = vmul.f32 %v180_v29, %v175_v31 }
  0xca   :  { %v357_v30 = vpop.f32.mrf.mxu0 }
  0xcb   :  { %v134_v34 = vadd.f32 %v357_v30, %v50_v28 }
  0xcc   :  { %v128_v36 = vpop.f32.mrf.mxu0 }
  0xcd   :  { %v152_v39 = vadd.f32 %v150_v33, %v134_v34  ;;  %v129_v40 = vadd.f32 %v128_v36, %v49_v32 }
  0xcf   :  { %v168_v43 = vadd.f32 %v166_v35, %v152_v39  ;;  %v151_v44 = vadd.f32 %v149_v38, %v129_v40 }
  0xd1   :  { %v184_v47 = vadd.f32 %v182_v41, %v168_v43  ;;  %v167_v48 = vadd.f32 %v165_v42, %v151_v44 }
  0xd3   :  { %v193_v49 = vadd.f32 %v331_v46, %v184_v47  ;;  %v183_v50 = vadd.f32 %v181_v45, %v167_v48 }
  0xd5   :  { %379 = vtanh.f32 %v193_v49  ;;  %v192_v51 = vadd.f32 %v331_v46, %v183_v50 }
  0xd7   :  { %381 = vtanh.f32 %v192_v51 }
  0xe2   :  { %v380_v52 = vpop.eup %379 }
  0xe3   :  { %v200_v53 = vsel %vm196_vm2, %v380_v52, 0.0  ;;  %v204_v54 = vmul.f32 %v380_v52, %v380_v52 }
  0xe4   :  { %v382_v55 = vpop.eup %381  ;;  %201 = vadd.xlane.f32.xlu0 %v200_v53 }
  0xe5   :  { %v197_v56 = vsel %vm196_vm2, %v382_v55, 0.0  ;;  %v203_v57 = vmul.f32 %v382_v55, %v382_v55  ;;  %v208_v58 = vsel %vm196_vm2, %v204_v54, 0.0 }
  0xe6   :  { %198 = vadd.xlane.f32.xlu1 %v197_v56 }
  0xe7   :  { %v205_v59 = vsel %vm196_vm2, %v203_v57, 0.0 }
  0xe8   :  { %209 = vadd.xlane.f32.xlu0 %v208_v58 }
  0xea   :  { %206 = vadd.xlane.f32.xlu1 %v205_v59 }
 0x16d   :  { %v202_v0 = vpop.xlane.xlu0 %201 }
 0x16e   :  { %v212_v1 = vmul.f32 0.03125, %v202_v0 }
 0x16f   :  { %v199_v2 = vpop.xlane.xlu1 %198 }
 0x170   :  { %v211_v3 = vmul.f32 0.03125, %v199_v2  ;;  %v216_v5 = vmul.f32 %v212_v1, %v212_v1  ;;  %v222_v19 = vsub.f32 %v380_v52, %v212_v1 }
 0x171   :  { %v210_v4 = vpop.xlane.xlu0 %209 }
 0x172   :  { %v214_v6 = vmul.f32 0.03125, %v210_v4  ;;  %v215_v8 = vmul.f32 %v211_v3, %v211_v3  ;;  %v221_v17 = vsub.f32 %v382_v55, %v211_v3 }
 0x173   :  { %v207_v7 = vpop.xlane.xlu1 %206 }
 0x174   :  { %v218_v9 = vsub.f32 %v214_v6, %v216_v5  ;;  %v213_v10 = vmul.f32 0.03125, %v207_v7 }
 0x176   :  { %v220_v11 = vmax.f32 %v218_v9, 0.0  ;;  %v217_v12 = vsub.f32 %v213_v10, %v215_v8 }
 0x178   :  { %v224_v13 = vadd.f32 1e-05, %v220_v11  ;;  %v219_v14 = vmax.f32 %v217_v12, 0.0 }
 0x17a   :  { %v223_v15 = vadd.f32 1e-05, %v219_v14  ;;  %383 = vrsqrt.f32 %v224_v13 }
 0x17c   :  { %385 = vrsqrt.f32 %v223_v15 }
 0x187   :  { %v384_v16 = vpop.eup %383 }
 0x188   :  { %v228_v21 = vmul.f32 %v384_v16, %v222_v19 }
 0x189   :  { %v386_v18 = vpop.eup %385 }
 0x18a   :  { %v227_v20 = vmul.f32 %v386_v18, %v221_v17 }
 0x18c   :  { %366 = vmatprep.mubr.msk.f32.mxu1 %vm196_vm2, %v227_v20 }
 0x18d   :  { %367 = vmatmul.mubr.msk.f32.vlgmr.msra.gmra.mxu1 %vm196_vm2, %v228_v21 }
 0x24d   :  { %v368_v23 = vpop.f32.mrf.mxu1 }
 0x24e   :  { %v318_v24 = vadd.f32 %v368_v23, %v332_v22 }
 0x24f   :  { %v312_v25 = vpop.f32.mrf.mxu1 }
 0x250   :  { %323 = vst.msk [vmem:[%s497_s7 + $0x8] sm:$0xff] %vm321_vm3, %v318_v24  ;;  %v313_v26 = vadd.f32 %v332_v22, %v312_v25 }
 0x252   :  { %322 = vst.msk [vmem:[%s497_s7] sm:$0xff] %vm321_vm3, %v313_v26 }

</bundles_post_ra>
